<compile_context>
chip_gen: v5e
topology: v5e:2x2
jax: 0.10.0
libtpu: 0.0.40
codegen_flags: <defaults>
</compile_context>

<pallas_src>
import math
import functools

import jax
import jax.numpy as jnp
from jax.experimental import pallas as pl
from jax.experimental.pallas import tpu as pltpu


# ---------------------------------------------------------------------------
# Pallas kernels
# ---------------------------------------------------------------------------

def _embed_combine_kernel(tok_ref, pos_ref, out_ref, *, scale):
    # out = tok_embedding(src) * sqrt(hid_dim) + pos_embedding(pos)
    out_ref[...] = tok_ref[...] * scale + pos_ref[...]


def _layernorm(x, gamma, beta, eps=1e-5):
    # f32 statistics (matches torch.nn.LayerNorm defaults)
    mean = jnp.mean(x, axis=-1, keepdims=True)
    var = jnp.mean((x - mean) * (x - mean), axis=-1, keepdims=True)
    return (x - mean) * jax.lax.rsqrt(var + eps) * gamma + beta


def _split_heads(t, n_heads, head_dim):
    # (rows, D) -> (H, rows, Dh): static lane slices + leading-axis stack
    # (leading-dim concat is cheap; avoids per-head MXU calls downstream).
    return jnp.stack(
        [t[:, h * head_dim:(h + 1) * head_dim] for h in range(n_heads)], axis=0)


def _encoder_layer_kernel(x_ref, mask_ref,
                          wq_ref, bq_ref, wk_ref, bk_ref, wv_ref, bv_ref,
                          wo_ref, bo_ref,
                          ln1g_ref, ln1b_ref,
                          w1_ref, b1_ref, w2_ref, b2_ref,
                          ln2g_ref, ln2b_ref,
                          out_ref, *, n_heads, head_dim, tq, pf_chunk):
    S = x_ref.shape[1]
    D = x_ref.shape[2]
    pf = w1_ref.shape[1]

    x_kv = x_ref[0]                              # (S, D) f32 (full sequence: K/V)
    if tq == S:                                  # static branch: one query tile
        x_q = x_kv
    else:
        q_start = pl.multiple_of(pl.program_id(1) * tq, tq)
        x_q = x_ref[0, pl.ds(q_start, tq), :]    # (tq, D) query rows of this step

    # mask bias hoisted out of any per-head work: (1, S), 0 = keep, -1e10 = drop
    mask = mask_ref[0]                           # (1, S) f32 (1.0 keep / 0.0 mask)
    mask_bias = jnp.where(mask == 0.0, jnp.float32(-1e10), jnp.float32(0.0))

    x_kv_b = x_kv.astype(jnp.bfloat16)
    x_q_b = x_q.astype(jnp.bfloat16)

    # ---- QKV projections: bf16 MXU matmuls, f32 accumulation ---------------
    q = jnp.dot(x_q_b, wq_ref[...], preferred_element_type=jnp.float32) + bq_ref[...]
    k = jnp.dot(x_kv_b, wk_ref[...], preferred_element_type=jnp.float32) + bk_ref[...]
    v = jnp.dot(x_kv_b, wv_ref[...], preferred_element_type=jnp.float32) + bv_ref[...]

    # fold 1/sqrt(head_dim) into q once (instead of scaling the (tq,S) scores)
    q = q * jnp.float32(1.0 / math.sqrt(head_dim))

    # head-major tensors: (H, tq, Dh) / (H, S, Dh)
    qh = _split_heads(q, n_heads, head_dim).astype(jnp.bfloat16)
    kh = _split_heads(k, n_heads, head_dim).astype(jnp.bfloat16)
    vh = _split_heads(v, n_heads, head_dim).astype(jnp.bfloat16)

    # ---- attention: two batched contractions over all heads ----------------
    energy = jnp.einsum('hqd,hkd->hqk', qh, kh,
                        preferred_element_type=jnp.float32)        # (H, tq, S)
    energy = energy + mask_bias[None, :, :]
    m = jnp.max(energy, axis=-1, keepdims=True)                    # f32 stats
    p = jnp.exp(energy - m)
    denom = jnp.sum(p, axis=-1, keepdims=True)
    attn = p * pl.reciprocal(denom, approx=True)                   # EUP divide

    ctx = jnp.einsum('hqk,hkd->hqd', attn.astype(jnp.bfloat16), vh,
                     preferred_element_type=jnp.float32)           # (H, tq, Dh)
    attn_out = jnp.concatenate([ctx[h] for h in range(n_heads)], axis=-1)
    attn_out = jnp.dot(attn_out.astype(jnp.bfloat16), wo_ref[...],
                       preferred_element_type=jnp.float32) + bo_ref[...]

    # ---- residual + layer norm (f32) ----------------------------------------
    y = _layernorm(x_q + attn_out, ln1g_ref[...], ln1b_ref[...])

    # ---- position-wise FFN, chunked over pf to cap the (tq, pf) intermediate -
    y_b = y.astype(jnp.bfloat16)
    n_chunks = pf // pf_chunk
    ff = jnp.zeros((tq, D), jnp.float32)
    for c in range(n_chunks):                    # static loop
        lo = c * pf_chunk
        h1 = jnp.maximum(
            jnp.dot(y_b, w1_ref[:, lo:lo + pf_chunk],
                    preferred_element_type=jnp.float32)
            + b1_ref[:, lo:lo + pf_chunk], 0.0)
        ff = ff + jnp.dot(h1.astype(jnp.bfloat16), w2_ref[lo:lo + pf_chunk, :],
                          preferred_element_type=jnp.float32)
    ff = ff + b2_ref[...]

    # ---- residual + layer norm (f32) ----------------------------------------
    z = _layernorm(y + ff, ln2g_ref[...], ln2b_ref[...])
    out_ref[0] = z


# ---------------------------------------------------------------------------
# Wrappers
# ---------------------------------------------------------------------------

def embed_combine(tok_emb, pos_emb, scale):
    B, S, D = tok_emb.shape
    return pl.pallas_call(
        functools.partial(_embed_combine_kernel, scale=scale),
        out_shape=jax.ShapeDtypeStruct((B, S, D), jnp.float32),
        grid=(B,),
        in_specs=[pl.BlockSpec((1, S, D), lambda b: (b, 0, 0)),
                  pl.BlockSpec((1, S, D), lambda b: (b, 0, 0))],
        out_specs=pl.BlockSpec((1, S, D), lambda b: (b, 0, 0)),
        compiler_params=pltpu.CompilerParams(dimension_semantics=("parallel",)),
    )(tok_emb, pos_emb)


def encoder_layer(x, mask3, params, n_heads):
    """x: (B,S,D) f32; mask3: (B,1,S) f32 (1=keep, 0=mask); params: dict."""
    B, S, D = x.shape
    head_dim = D // n_heads
    pf = params["w1"].shape[1]

    # query-row tiling (extra parallel grid axis for long sequences / megacore)
    tq = 128 if (S > 128 and S % 128 == 0) else S
    nq = S // tq
    # FFN hidden-dim chunking: cap the (tq, pf) intermediate
    pf_chunk = 512 if (pf > 512 and pf % 512 == 0) else pf

    weights = [params["wq"], params["bq"], params["wk"], params["bk"],
               params["wv"], params["bv"], params["wo"], params["bo"],
               params["ln1_g"], params["ln1_b"],
               params["w1"], params["b1"], params["w2"], params["b2"],
               params["ln2_g"], params["ln2_b"]]
    # Constant index maps -> weight blocks are not re-fetched across grid steps.
    # TODO(synk): at production sizes, single-buffer these resident weights
    # (pipeline_mode=pl.Buffered(1)) to avoid the default 2x VMEM allocation.
    weight_specs = [pl.BlockSpec(w.shape, (lambda b, q, nd=w.ndim: (0,) * nd))
                    for w in weights]

    # explicit scoped-VMEM budget based on the working set (weights + tiles)
    weight_bytes = sum(int(w.size) * w.dtype.itemsize for w in weights)
    act_bytes = 4 * (6 * S * D + 3 * n_heads * tq * S
                     + 2 * tq * pf_chunk + 8 * tq * D)
    vmem_limit = int(min(max(2 * weight_bytes + 2 * act_bytes + (4 << 20),
                             32 << 20), 64 << 20))

    kernel = functools.partial(_encoder_layer_kernel, n_heads=n_heads,
                               head_dim=head_dim, tq=tq, pf_chunk=pf_chunk)
    return pl.pallas_call(
        kernel,
        out_shape=jax.ShapeDtypeStruct((B, S, D), jnp.float32),
        grid_spec=pltpu.PrefetchScalarGridSpec(
            num_scalar_prefetch=0,
            grid=(B, nq),
            in_specs=[pl.BlockSpec((1, S, D), lambda b, q: (b, 0, 0)),   # x (K/V + Q rows)
                      pl.BlockSpec((1, 1, S), lambda b, q: (b, 0, 0)),   # mask
                      ] + weight_specs,
            out_specs=pl.BlockSpec((1, tq, D), lambda b, q: (b, q, 0)),
        ),
        compiler_params=pltpu.CompilerParams(
            dimension_semantics=("parallel", "parallel"),
            vmem_limit_bytes=vmem_limit),
    )(x, mask3, *weights)


def encoder_forward(src, src_mask, enc_params, *, n_heads):
    """src: (B,S) int32 token ids; src_mask: (B,1,1,S) {0,1}."""
    B, S = src.shape
    tok_table = enc_params["tok_embedding"]     # (vocab, D) f32
    pos_table = enc_params["pos_embedding"]     # (vocab, D) f32
    D = tok_table.shape[1]

    # embedding gathers are glue (plain JAX); scale+add done in a tiled kernel
    pos = jnp.broadcast_to(jnp.arange(S, dtype=jnp.int32)[None, :], (B, S))
    tok_emb = jnp.take(tok_table, src, axis=0)          # (B,S,D)
    pos_emb = jnp.take(pos_table, pos, axis=0)          # (B,S,D)
    x = embed_combine(tok_emb, pos_emb, float(math.sqrt(D)))

    mask3 = src_mask.reshape(B, 1, S).astype(jnp.float32)
    for layer_params in enc_params["layers"]:
        x = encoder_layer(x, mask3, layer_params, n_heads)
    return x


# ---------------------------------------------------------------------------
# Deterministic parameter construction (matmul weights stored in bf16)
# ---------------------------------------------------------------------------

def make_params(key, vocab, hid_dim, pf_dim, n_layers):
    def nrm(k, shape, s=0.02, dtype=jnp.float32):
        return (jax.random.normal(k, shape, dtype=jnp.float32) * s).astype(dtype)

    bf = jnp.bfloat16
    keys = jax.random.split(key, 2 + n_layers)
    params = {
        "tok_embedding": nrm(keys[0], (vocab, hid_dim), 1.0),
        "pos_embedding": nrm(keys[1], (vocab, hid_dim), 1.0),
        "layers": [],
    }
    for li in range(n_layers):
        ks = jax.random.split(keys[2 + li], 12)
        lp = {
            "wq": nrm(ks[0], (hid_dim, hid_dim), dtype=bf), "bq": nrm(ks[1], (1, hid_dim)),
            "wk": nrm(ks[2], (hid_dim, hid_dim), dtype=bf), "bk": nrm(ks[3], (1, hid_dim)),
            "wv": nrm(ks[4], (hid_dim, hid_dim), dtype=bf), "bv": nrm(ks[5], (1, hid_dim)),
            "wo": nrm(ks[6], (hid_dim, hid_dim), dtype=bf), "bo": nrm(ks[7], (1, hid_dim)),
            "ln1_g": jnp.ones((1, hid_dim), jnp.float32),
            "ln1_b": jnp.zeros((1, hid_dim), jnp.float32),
            "w1": nrm(ks[8], (hid_dim, pf_dim), dtype=bf), "b1": nrm(ks[9], (1, pf_dim)),
            "w2": nrm(ks[10], (pf_dim, hid_dim), dtype=bf), "b2": nrm(ks[11], (1, hid_dim)),
            "ln2_g": jnp.ones((1, hid_dim), jnp.float32),
            "ln2_b": jnp.zeros((1, hid_dim), jnp.float32),
        }
        params["layers"].append(lp)
    return params


# ---------------------------------------------------------------------------

if __name__ == "__main__":
    B, S = 2, 8
    vocab, hid_dim, n_layers, n_heads, pf_dim = 50, 32, 2, 4, 64

    key = jax.random.PRNGKey(0)
    kp, ks, km = jax.random.split(key, 3)
    params = make_params(kp, vocab, hid_dim, pf_dim, n_layers)

    src = jax.random.randint(ks, (B, S), 0, vocab, dtype=jnp.int32)
    # src_mask: [B, 1, 1, S]; mask out the last two key positions of batch 1
    src_mask = jnp.ones((B, 1, 1, S), dtype=jnp.int32)
    src_mask = src_mask.at[1, 0, 0, -2:].set(0)

    out = encoder_forward(src, src_mask, params, n_heads=n_heads)
    out = jax.block_until_ready(out)
    assert out.shape == (B, S, hid_dim)
    assert jnp.all(jnp.isfinite(out))
    print("KERNEL_OK")
</pallas_src>

<mosaic_0001>
module attributes {stable_mosaic.version = 11 : i64} {
  func.func @_embed_combine_kernel(%arg0: i32, %arg1: memref<1x8x32xf32, #tpu.memory_space<vmem>>, %arg2: memref<1x8x32xf32, #tpu.memory_space<vmem>>, %arg3: memref<1x8x32xf32, #tpu.memory_space<vmem>>) attributes {dimension_semantics = [#tpu.dimension_semantics<parallel>], iteration_bounds = array<i64: 2>, scalar_prefetch = 0 : i64, scratch_operands = 0 : i64, tpu.core_type = #tpu.core_type<tc>, window_params = [{transform_indices = @transform_0, window_bounds = array<i64: 1, 8, 32>}, {transform_indices = @transform_1, window_bounds = array<i64: 1, 8, 32>}, {transform_indices = @transform_2, window_bounds = array<i64: 1, 8, 32>}]} {
    %c0 = arith.constant 0 : index
    %c0_0 = arith.constant 0 : index
    %c0_1 = arith.constant 0 : index
    %0 = vector.load %arg1[%c0, %c0_0, %c0_1] : memref<1x8x32xf32, #tpu.memory_space<vmem>>, vector<1x8x32xf32>
    %cst = arith.constant 5.65685415 : f32
    %1 = vector.broadcast %cst : f32 to vector<1x8x32xf32>
    %2 = arith.mulf %0, %1 : vector<1x8x32xf32>
    %c0_2 = arith.constant 0 : index
    %c0_3 = arith.constant 0 : index
    %c0_4 = arith.constant 0 : index
    %3 = vector.load %arg2[%c0_2, %c0_3, %c0_4] : memref<1x8x32xf32, #tpu.memory_space<vmem>>, vector<1x8x32xf32>
    %4 = arith.addf %2, %3 : vector<1x8x32xf32>
    %c0_5 = arith.constant 0 : index
    %c0_6 = arith.constant 0 : index
    %c0_7 = arith.constant 0 : index
    %5 = vector.load %arg3[%c0_5, %c0_6, %c0_7] : memref<1x8x32xf32, #tpu.memory_space<vmem>>, vector<1x8x32xf32>
    tpu.vector_store %arg3[%c0_5, %c0_6, %c0_7], %4 {strides = array<i32>} : memref<1x8x32xf32, #tpu.memory_space<vmem>>, vector<1x8x32xf32>,
    return
  }
  func.func @transform_0(%arg0: i32) -> (i32, i32, i32) {
    %c0_i32 = arith.constant 0 : i32
    %c0_i32_0 = arith.constant 0 : i32
    %c0_i32_1 = arith.constant 0 : i32
    return %arg0, %c0_i32, %c0_i32_0 : i32, i32, i32
  }
  func.func @transform_1(%arg0: i32) -> (i32, i32, i32) {
    %c0_i32 = arith.constant 0 : i32
    %c0_i32_0 = arith.constant 0 : i32
    %c0_i32_1 = arith.constant 0 : i32
    return %arg0, %c0_i32, %c0_i32_0 : i32, i32, i32
  }
  func.func @transform_2(%arg0: i32) -> (i32, i32, i32) {
    %c0_i32 = arith.constant 0 : i32
    %c0_i32_0 = arith.constant 0 : i32
    %c0_i32_1 = arith.constant 0 : i32
    return %arg0, %c0_i32, %c0_i32_0 : i32, i32, i32
  }
}

</mosaic_0001>

<bundles_post_ra>
// kernel: tpu_custom_call.1
= control target key start
LH: loop header
LB: loop body
LE: loop exit
PB: predicated region body
PF: predicated region fallthrough
CT: control target
= control target key end

     0   :  { %7 = vsyncpa [#allocation3], 0  ;;  %s688_s0 = inlined_call_operand.hbm [shape: f32[2,8,32], index: 0, kind: input, shape index: {}]   ;;  %s689_s1 = inlined_call_operand.hbm [shape: f32[2,8,32], index: 1, kind: input, shape index: {}]   ;;  %s690_s2 = inlined_call_operand.hbm [shape: f32[2,8,32], index: 2, kind: output, shape index: {}]  }
   0x1   :  { %9 = vsyncpa [#allocation3 + $0x1], 0 }
   0x2   :  { %10 = vsyncpa [#allocation6], 0 }
   0x3   :  { %12 = vsyncpa [#allocation6 + $0x1], 0 }
   0x4   :  { %13 = vsyncpa [#allocation4], 0 }
   0x5   :  { %15 = vsyncpa [#allocation4 + $0x1], 0  ;;  %s528_s9 = smov 0   ;;  %s530_s10 = smov 0  }
   0x6   :  { %s532_s11 = smov 0   ;;  %s534_s12 = smov 0  }
   0x7 LB: > { %s549_s13 = sadd.s32 4294967295, %s511_s12   ;;  %s315_s14 = sadd.s32 4294967294, %s511_s12   ;;  %s511_s12 = sphi %s534_s12, %s701_s12   ;;  %s507_s11 = sphi %s532_s11, %s700_s11   ;;  %s503_s10 = sphi %s530_s10, %s699_s10   ;;  %s499_s9 = sphi %s528_s9, %s698_s9  }
   0x8   : > { %s553_s15 = sadd.s32 1, %s511_s12   ;;  %s28_s16 = sadd.s32 1, %s507_s11 }
   0x9   : > { %s25_s17 = ssub.s32 %s511_s12, %s553_s15  ;;  %p35_p0 = scmp.ne.s32.totalorder %s507_s11, %s503_s10 }
   0xa   : > { %p26_p1 = scmp.eq.s32.totalorder %s25_s17, 0  ;;  %p36_p2 = scmp.eq.s32.totalorder %s511_s12, 0 }
   0xb   : > { %p41_p3 = scmp.ne.s32.totalorder %s503_s10, %s499_s9  ;;  %p42_p4 = scmp.eq.s32.totalorder %s549_s13, 0 }
   0xc   : > { %s565_s18 = scalar_select %p26_p1, %s507_s11, %s28_s16  }
   0xd   : > { %p567_p5 = por %p36_p2, %p35_p0  ;;  %p571_p6 = por %p42_p4, %p41_p3 }
   0xe   : > { %p91_p7 = scmp.eq.s32.totalorder %s549_s13, 1  ;;  %p97_p8 = scmp.eq.s32.totalorder %s315_s14, 1 }
   0xf   : > { %p347_p10 = scmp.lt.s32.totalorder %s511_s12, 2  ;;  %s587_s23 = sand.u32 1, %s507_s11  }
  0x10   : > { %p578_p11 = por %p91_p7, %p35_p0  ;;  %p582_p12 = por %p97_p8, %p41_p3 }
  0x11   : > { %s319_s24 = sshll.u32 %s511_s12, 3  ;;  %s318_s25 = sshll.u32 %s587_s23, 3 }
  0x12   : > { %s125_s28 = scalar_lea.hbm %s688_s0, %s319_s24  ;;  %s121_s30 = scalar_lea.vmem [#allocation2], %s318_s25 }
  0x13   : > { %s127_s29 = sshll.u32 %s125_s28, 4  ;;  %s129_s3 = sshll.u32 %s121_s30, 4  ;;  %s128_s29 = int_to_ptr.hbm [resolvable:$true] %s127_s29  ;;  %s130_s3 = int_to_ptr.vmem [resolvable:$true] %s129_s3 }
  0x14   : > { %p596_p13 = pnand %p347_p10, %p567_p5  ;;  %p322_p0 = scmp.ge.s32.totalorder %s511_s12, 1 }
  0x15   : > { %p153_p1 = scmp.lt.s32.totalorder %s511_s12, 3  ;;  %s118_s5 = scalar_lea.sflag [#allocation3], %s587_s23 }
  0x16   : > { %s381_s6 = sshra.s32 %s128_s29, 4  ;;  %p385_p3 = pneg %p596_p13  ;;  %s382_s6 = int_to_ptr.hbm [resolvable:$true] %s381_s6 }
  0x17   : > { %s383_s7 = scalar_lea.hbm %s382_s6, 8  ;;  %s388_s16 = scalar_lea.hbm %s688_s0, 16 }
  0x18   : > { %p384_p2 = scmp.ne.s32.totalorder %s382_s6, %s383_s7  ;;  %p389_p5 = scmp.lt.s32.totalorder %s382_s6, %s688_s0 }
  0x19   : > { %p390_p8 = scmp.lt.s32.totalorder %s388_s16, %s383_s7 }
  0x1a   : > { %p386_p4 = pnand %p385_p3, %p384_p2 }
  0x1b   : > { %p391_p10 = por %p390_p8, %p389_p5 }
  0x1c   : > { %p387_p7 = pneg %p386_p4 }
  0x1e   : > { %p392_p9 = pnand %p391_p10, %p387_p7 }
  0x20   : > { %395 = shalt.err (!%p392_p9)
}
  0x21   : > { %339 = dma.hbm_to_vmem [thread:$0]  (!%p596_p13), %s128_s29, 128, %s130_s3, %s118_s5  }
  0x22   : > { %p620_p2 = pnand %p322_p0, %p153_p1  ;;  %s144_s30 = scalar_lea.hbm %s689_s1, %s319_s24 }
  0x23   : > { %s146_s6 = sshll.u32 %s144_s30, 4  ;;  %s140_s7 = scalar_lea.vmem [#allocation5], %s318_s25  ;;  %s147_s6 = int_to_ptr.hbm [resolvable:$true] %s146_s6 }
  0x24   : > { %s148_s8 = sshll.u32 %s140_s7, 4  ;;  %s137_s14 = scalar_lea.sflag [#allocation6], %s587_s23  ;;  %s149_s8 = int_to_ptr.vmem [resolvable:$true] %s148_s8 }
  0x25   : > { %s411_s16 = sshra.s32 %s147_s6, 4  ;;  %s418_s5 = scalar_lea.hbm %s689_s1, 16  ;;  %s412_s16 = int_to_ptr.hbm [resolvable:$true] %s411_s16 }
  0x26   : > { %s413_s17 = scalar_lea.hbm %s412_s16, 8  ;;  %p419_p4 = scmp.lt.s32.totalorder %s412_s16, %s689_s1 }
  0x27   : > { %p414_p9 = scmp.ne.s32.totalorder %s412_s16, %s413_s17  ;;  %p420_p7 = scmp.lt.s32.totalorder %s418_s5, %s413_s17 }
  0x29   : > { %p416_p0 = pnand %p414_p9, %p385_p3  ;;  %p421_p5 = por %p420_p7, %p419_p4 }
  0x2b   : > { %p417_p1 = pneg %p416_p0 }
  0x2d   : > { %p422_p8 = pnand %p421_p5, %p417_p1 }
  0x2f   : > { %425 = shalt.err (!%p422_p8)
}
  0x30   : > { %342 = dma.hbm_to_vmem [thread:$0]  (!%p596_p13), %s147_s6, 128, %s149_s8, %s137_s14  }
  0x31   : > { %157 = sbr.rel (%p620_p2) target bundleno = 72 (0x48), region = 28  ;;  %s642_s23 = sand.u32 (!%p620_p2), 1, %s503_s10  }
  0x32   : > { %s323_s25 = sshll.u32 (!%p620_p2), %s642_s23, 3  ;;  %s160_s27 = scalar_lea.sflag (!%p620_p2), [#allocation3], %s642_s23 }
  0x33   : > { %s163_s28 = scalar_lea.vmem (!%p620_p2), [#allocation2], %s323_s25 }
  0x36   : > { %486 = dma.done.wait (%p571_p6), %s160_s27, 128  }
  0x37   : > { %488 = vsyncadd (%p571_p6), %s160_s27, 4294967168  ;;  %s170_s4 = scalar_lea.sflag [#allocation6], %s642_s23  ;;  %s173_s30 = scalar_lea.vmem [#allocation5], %s323_s25 }
  0x38   : > { %490 = dma.done.wait (%p571_p6), %s170_s4, 128  }
  0x39   : > { %492 = vsyncadd (%p571_p6), %s170_s4, 4294967168  ;;  %s327_s26 = sshll.u32 %s549_s13, 3  ;;  %v200_v0 = vld [vmem:[%s163_s28] sm:$0xff]  ;;  %v202_v1 = vld [vmem:[%s173_s30] sm:$0xff]  ;;  %s199_s14 = scalar_lea.vmem [#allocation7], %s323_s25  ;;  %vm204_vm0 = vcmask 261120  }
  0x3a   : > { %s217_s8 = scalar_lea.hbm %s690_s2, %s327_s26  ;;  %s219_s16 = sshll.u32 %s199_s14, 4  ;;  %v201_v2 = vmul.f32 5.656854, %v200_v0  ;;  %s220_s16 = int_to_ptr.vmem [resolvable:$true] %s219_s16 }
  0x3b   : > { %s221_s17 = sshll.u32 %s217_s8, 4  ;;  %s207_s20 = scalar_lea.sflag [#allocation4], %s642_s23  ;;  %s222_s17 = int_to_ptr.hbm [resolvable:$true] %s221_s17 }
  0x3c   : > { %v203_v3 = vadd.f32 %v202_v1, %v201_v2  ;;  %s455_s29 = sshra.s32 %s222_s17, 4  ;;  %s461_s19 = scalar_lea.hbm %s690_s2, 16  ;;  %s456_s29 = int_to_ptr.hbm [resolvable:$true] %s455_s29 }
  0x3d   : > { %s457_s13 = scalar_lea.hbm %s456_s29, 8  ;;  %p462_p10 = scmp.lt.s32.totalorder %s456_s29, %s690_s2 }
  0x3e   : > { %205 = vst.msk [vmem:[%s199_s14] sm:$0xff] %vm204_vm0, %v203_v3  ;;  %p458_p6 = scmp.ne.s32.totalorder %s456_s29, %s457_s13  ;;  %p463_p2 = scmp.lt.s32.totalorder %s461_s19, %s457_s13 }
  0x40   : > { %p459_p13 = pnand %p458_p6, %p578_p11  ;;  %p464_p9 = por %p463_p2, %p462_p10 }
  0x42   : > { %p460_p3 = pneg %p459_p13 }
  0x44   : > { %p465_p0 = pnand %p464_p9, %p460_p3 }
  0x46   : > { %468 = shalt.err (!%p465_p0)
}
  0x47   : > { %334 = dma.vmem_to_hbm [thread:$0]  (%p578_p11), %s220_s16, 128, %s222_s17, %s207_s20  }
  0x48 PF: > { %s233_s23 = sand.u32 1, %s499_s9   ;;  %p697_p1 = scmp.ge.s32.totalorder %s511_s12, 2 }
  0x49   : > { %s234_s27 = scalar_lea.sflag [#allocation4], %s233_s23 }
  0x4a   : > { %p344_p4 = pnand %p697_p1, %p582_p12 }
  0x4c   : > { %p345_p7 = pneg %p344_p4 }
  0x4e   : > { %494 = dma.done.wait (%p345_p7), %s234_s27, 128  }
  0x4f   : > { %496 = vsyncadd (%p345_p7), %s234_s27, 4294967168  ;;  %p18_p5 = scmp.ge.s32.totalorder %s553_s15, 4   ;;  %s698_s9 = smov %s503_s10 }
  0x50   : > { %s699_s10 = smov %s507_s11  ;;  %s700_s11 = smov %s565_s18 }
  0x51   : > { %s701_s12 = smov %s553_s15  ;;  %20 = sbr.rel (!%p18_p5) target bundleno = 7 (0x7), region = 86 }
  0x56   :  { %240 = vsyncpa [#allocation3], 1 }
  0x57   :  { %242 = vsyncpa [#allocation3 + $0x1], 1 }
  0x58   :  { %243 = vsyncpa [#allocation6], 1 }
  0x59   :  { %245 = vsyncpa [#allocation6 + $0x1], 1 }
  0x5a   :  { %246 = vsyncpa [#allocation4], 1 }
  0x5b   :  { %248 = vsyncpa [#allocation4 + $0x1], 1 }

</bundles_post_ra>
